<compile_context>
chip_gen: v7x
topology: tpu7x:2x2x1
jax: 0.10.0
libtpu: 0.0.40
codegen_flags: <defaults>
</compile_context>

<pallas_src>
import functools

import jax
import jax.numpy as jnp
from jax.experimental import pallas as pl
from jax.experimental.pallas import tpu as pltpu


_HDR = 8  # header rows of the packed parameter slab (sublane-aligned block)


# ---------------------------------------------------------------------------
# Kernel
# ---------------------------------------------------------------------------

def _lstm_gates(gates, c_prev, H):
    """PyTorch LSTM gate order: i, f, g, o."""
    i_g = jax.nn.sigmoid(gates[:, 0 * H:1 * H])
    f_g = jax.nn.sigmoid(gates[:, 1 * H:2 * H])
    g_g = jnp.tanh(gates[:, 2 * H:3 * H])
    o_g = jax.nn.sigmoid(gates[:, 3 * H:4 * H])
    c_new = f_g * c_prev + i_g * g_g
    h_new = o_g * jnp.tanh(c_new)
    return h_new, c_new


def _lstm_stack_step(inp, state, p_ref, n_layers, hid_dim):
    """One time step through the L-layer LSTM stack + fc_out.

    inp   : (B, 1)          current-step input (LSTM in_dim == 1, see NOTE)
    state : (B, 2*L*H)      packed [h_0 .. h_{L-1} | c_0 .. c_{L-1}]
    p_ref : (HDR+2LH, 4H)   packed parameter slab (see pack_params)
    returns (pred (B, 4H) lane-padded, new_state (B, 2*L*H))
    """
    L, H = n_layers, hid_dim
    h_news, c_news = [], []

    # Layer 0: in_dim == 1, so the input projection is a VPU broadcast multiply
    # (no zero-padded rows pushed through the MXU).
    h_prev = state[:, 0:H]
    c_prev = state[:, L * H:(L + 1) * H]
    gates = (inp * p_ref[0:1, :]
             + jnp.dot(h_prev, p_ref[_HDR:_HDR + H, :],
                       preferred_element_type=jnp.float32)
             + p_ref[1:2, :])
    x, c_new = _lstm_gates(gates, c_prev, H)
    h_news.append(x)
    c_news.append(c_new)

    # Layers 1..L-1: fused [x | h_prev] @ [W_ih^T ; W_hh^T] — one MXU pass each.
    off = _HDR + H
    for l in range(1, L):
        h_prev = state[:, l * H:(l + 1) * H]
        c_prev = state[:, (L + l) * H:(L + l + 1) * H]
        xh = jnp.concatenate([x, h_prev], axis=-1)                 # (B, 2H)
        gates = (jnp.dot(xh, p_ref[off:off + 2 * H, :],
                         preferred_element_type=jnp.float32)
                 + p_ref[1 + l:2 + l, :])
        x, c_new = _lstm_gates(gates, c_prev, H)
        h_news.append(x)
        c_news.append(c_new)
        off += 2 * H

    # fc_out on the last layer's hidden (== the seq-len-1 LSTM output).
    pred = (jnp.dot(x, p_ref[off:off + H, :], preferred_element_type=jnp.float32)
            + p_ref[L + 1:L + 2, :])
    new_state = jnp.concatenate(h_news + c_news, axis=-1)          # (B, 2LH)
    return pred, new_state


def decoder_kernel(inp_seq_ref, state_ref, p_ref, pred_seq_ref, state_out_ref,
                   *, n_layers, hid_dim, n_steps):
    """n_steps decoder steps with weights resident in VMEM; state carried in
    registers across steps and written back once (one unmasked full-width vst).

    inp_seq_ref  : (T, B, 1)        per-step inputs
    state_ref    : (B, 2*L*H)       packed initial [h | c]
    p_ref        : (HDR+2LH, 4H)    parameter slab
    pred_seq_ref : (T, B, 4H)       lane-padded predictions (first out_dim valid)
    state_out_ref: (B, 2*L*H)       packed final [h | c]
    """
    state = state_ref[...]
    for t in range(n_steps):                      # static unroll (small T)
        pred, state = _lstm_stack_step(inp_seq_ref[t], state, p_ref,
                                       n_layers, hid_dim)
        pred_seq_ref[t] = pred                    # lane-dense (B, 4H) store
    state_out_ref[...] = state                    # single full-width writeback


# ---------------------------------------------------------------------------
# Packing / wrappers
# ---------------------------------------------------------------------------

def pack_params(lstm_params, w_fc, b_fc, hid_dim):
    """Pack PyTorch-shaped parameters into one flat (HDR+2LH, 4H) f32 slab.

    Layout (all rows 4H lanes wide, all weight-block offsets multiples of 8):
      row 0              : layer-0 input weight row  (w_ih_l0[:, 0])
      rows 1..L          : per-layer gate biases     (b_ih + b_hh)
      row L+1            : fc_out bias, zero-padded
      rows HDR..HDR+H    : layer-0 W_hh^T
      next 2H rows / lyr : [W_ih^T ; W_hh^T] for layers 1..L-1
      last H rows        : fc_out.weight^T zero-padded to 4H lanes
    """
    H = hid_dim
    L = len(lstm_params)
    W = 4 * H
    assert L + 2 <= _HDR, "header block too small for this n_layers"
    assert lstm_params[0][0].shape[1] == 1, "module implies LSTM in_dim == 1"

    p = jnp.zeros((_HDR + 2 * L * H, W), jnp.float32)
    p = p.at[0, :].set(lstm_params[0][0][:, 0])                    # w_ih_l0 row
    for l, (_, _, b_ih, b_hh) in enumerate(lstm_params):
        p = p.at[1 + l, :].set(b_ih + b_hh)
    out_dim = w_fc.shape[0]
    p = p.at[L + 1, :out_dim].set(b_fc)

    off = _HDR
    p = p.at[off:off + H, :].set(lstm_params[0][1].T)              # W_hh0^T
    off += H
    for l in range(1, L):
        w_ih, w_hh = lstm_params[l][0], lstm_params[l][1]
        p = p.at[off:off + H, :].set(w_ih.T)
        p = p.at[off + H:off + 2 * H, :].set(w_hh.T)
        off += 2 * H
    p = p.at[off:off + H, :out_dim].set(w_fc.T)                    # fc weight
    return p


def pack_state(hidden, cell):
    """(L,B,H) hidden/cell -> packed (B, 2*L*H) [h_0..h_{L-1} | c_0..c_{L-1}]."""
    L, B, H = hidden.shape
    return jnp.concatenate(
        [hidden.transpose(1, 0, 2).reshape(B, L * H),
         cell.transpose(1, 0, 2).reshape(B, L * H)], axis=-1)


def unpack_state(state, n_layers, hid_dim):
    """Packed (B, 2*L*H) -> ((L,B,H) hidden, (L,B,H) cell)."""
    B = state.shape[0]
    L, H = n_layers, hid_dim
    h = state[:, :L * H].reshape(B, L, H).transpose(1, 0, 2)
    c = state[:, L * H:].reshape(B, L, H).transpose(1, 0, 2)
    return h, c


def _decoder_call(inp_seq, state, params, *, n_layers, hid_dim):
    T, B, _ = inp_seq.shape
    S = state.shape[1]
    W = params.shape[1]
    kernel = functools.partial(decoder_kernel, n_layers=n_layers,
                               hid_dim=hid_dim, n_steps=T)
    # No grid: the whole ~80 KiB working set lives in VMEM as whole blocks.
    # (For large B on v7x, add a batch-tile grid axis with
    #  dimension_semantics=("parallel",) and an explicit vmem_limit_bytes.)
    return pl.pallas_call(
        kernel,
        out_shape=(jax.ShapeDtypeStruct((T, B, W), jnp.float32),
                   jax.ShapeDtypeStruct((B, S), jnp.float32)),
        in_specs=[pl.BlockSpec(memory_space=pltpu.MemorySpace.VMEM)] * 3,
        out_specs=(pl.BlockSpec(memory_space=pltpu.MemorySpace.VMEM),) * 2,
    )(inp_seq, state, params)


def decoder_forward(inp, hidden, cell, params):
    """Module-equivalent single step: (pred, hidden', cell')."""
    L, B, H = hidden.shape
    out_dim = inp.shape[1]
    state = pack_state(hidden, cell)
    pred_seq, state_out = _decoder_call(inp[None], state, params,
                                        n_layers=L, hid_dim=H)
    h_new, c_new = unpack_state(state_out, L, H)
    return pred_seq[0, :, :out_dim], h_new, c_new


def decoder_decode(inp_seq, state, params, *, n_layers, hid_dim, output_dim):
    """Fused T-step decode (inputs supplied per step): semantically identical
    to T sequential Decoder.forward calls, but weights are DMA'd once and the
    state never round-trips HBM between steps."""
    pred_seq, state_out = _decoder_call(inp_seq, state, params,
                                        n_layers=n_layers, hid_dim=hid_dim)
    return pred_seq[:, :, :output_dim], state_out


# ---------------------------------------------------------------------------
# Pure-JAX reference (PyTorch single-step LSTM + Linear, gate order i,f,g,o)
# ---------------------------------------------------------------------------

def reference_forward(inp, hidden, cell, lstm_params, w_fc, b_fc):
    L, B, H = hidden.shape
    x = inp
    h_out, c_out = [], []
    for l, (w_ih, w_hh, b_ih, b_hh) in enumerate(lstm_params):
        gates = x @ w_ih.T + hidden[l] @ w_hh.T + b_ih + b_hh
        i_g = jax.nn.sigmoid(gates[:, 0 * H:1 * H])
        f_g = jax.nn.sigmoid(gates[:, 1 * H:2 * H])
        g_g = jnp.tanh(gates[:, 2 * H:3 * H])
        o_g = jax.nn.sigmoid(gates[:, 3 * H:4 * H])
        c_new = f_g * cell[l] + i_g * g_g
        h_new = o_g * jnp.tanh(c_new)
        h_out.append(h_new)
        c_out.append(c_new)
        x = h_new
    pred = x @ w_fc.T + b_fc
    return pred, jnp.stack(h_out), jnp.stack(c_out)


def reference_decode(inp_seq, hidden, cell, lstm_params, w_fc, b_fc):
    preds = []
    for t in range(inp_seq.shape[0]):
        pred, hidden, cell = reference_forward(inp_seq[t], hidden, cell,
                                               lstm_params, w_fc, b_fc)
        preds.append(pred)
    return jnp.stack(preds), hidden, cell


if __name__ == "__main__":
    output_dim = 1     # forced to 1 by input.unsqueeze(-1) feeding the LSTM
    hid_dim = 32
    n_layers = 2
    batch = 8
    n_steps = 4        # fused multi-step decode demo

    H, L, B = hid_dim, n_layers, batch
    key = jax.random.PRNGKey(0)
    ks = jax.random.split(key, 4 * n_layers + 5)
    bound = 1.0 / jnp.sqrt(jnp.float32(H))

    def uni(k, shape):
        return jax.random.uniform(k, shape, jnp.float32, -bound, bound)

    # Deterministic synthetic parameters in PyTorch LSTM shapes (gates i,f,g,o).
    lstm_params = []
    for l in range(L):
        in_dim = output_dim if l == 0 else H
        w_ih = uni(ks[4 * l + 0], (4 * H, in_dim))     # weight_ih_l{l}
        w_hh = uni(ks[4 * l + 1], (4 * H, H))          # weight_hh_l{l}
        b_ih = uni(ks[4 * l + 2], (4 * H,))
        b_hh = uni(ks[4 * l + 3], (4 * H,))
        lstm_params.append((w_ih, w_hh, b_ih, b_hh))

    w_fc = uni(ks[4 * L + 0], (output_dim, H))         # fc_out.weight
    b_fc = uni(ks[4 * L + 1], (output_dim,))           # fc_out.bias

    inp = jax.random.normal(ks[4 * L + 2], (B, output_dim), jnp.float32)
    hc_key = jax.random.split(ks[4 * L + 3], 2)
    hidden0 = jax.random.normal(hc_key[0], (L, B, H), jnp.float32)
    cell0 = jax.random.normal(hc_key[1], (L, B, H), jnp.float32)
    inp_seq = jax.random.normal(ks[4 * L + 4], (n_steps, B, output_dim),
                                jnp.float32)

    params = pack_params(lstm_params, w_fc, b_fc, H)

    # --- single step: module-equivalent forward ---
    pred, h_new, c_new = decoder_forward(inp, hidden0, cell0, params)
    jax.block_until_ready((pred, h_new, c_new))

    pred_r, h_r, c_r = reference_forward(inp, hidden0, cell0,
                                         lstm_params, w_fc, b_fc)
    assert pred.shape == (B, output_dim)
    assert h_new.shape == (L, B, H) and c_new.shape == (L, B, H)
    assert jnp.allclose(pred, pred_r, atol=1e-5, rtol=1e-5)
    assert jnp.allclose(h_new, h_r, atol=1e-5, rtol=1e-5)
    assert jnp.allclose(c_new, c_r, atol=1e-5, rtol=1e-5)

    # --- fused multi-step decode: weights resident, state in registers ---
    state0 = pack_state(hidden0, cell0)
    preds_seq, state_T = decoder_decode(inp_seq, state0, params,
                                        n_layers=L, hid_dim=H,
                                        output_dim=output_dim)
    jax.block_until_ready((preds_seq, state_T))

    preds_r, h_rT, c_rT = reference_decode(inp_seq, hidden0, cell0,
                                           lstm_params, w_fc, b_fc)
    h_T, c_T = unpack_state(state_T, L, H)
    assert preds_seq.shape == (n_steps, B, output_dim)
    assert jnp.allclose(preds_seq, preds_r, atol=1e-4, rtol=1e-4)
    assert jnp.allclose(h_T, h_rT, atol=1e-4, rtol=1e-4)
    assert jnp.allclose(c_T, c_rT, atol=1e-4, rtol=1e-4)

    print("KERNEL_OK")
</pallas_src>

<mosaic_0001>
module attributes {stable_mosaic.version = 11 : i64} {
  func.func @decoder_kernel(%arg0: memref<1x8x1xf32, #tpu.memory_space<vmem>>, %arg1: memref<8x128xf32, #tpu.memory_space<vmem>>, %arg2: memref<136x128xf32, #tpu.memory_space<vmem>>, %arg3: memref<1x8x128xf32, #tpu.memory_space<vmem>>, %arg4: memref<8x128xf32, #tpu.memory_space<vmem>>) attributes {dimension_semantics = [], scalar_prefetch = 0 : i64, scratch_operands = 0 : i64, tpu.core_type = #tpu.core_type<tc>} {
    %c0 = arith.constant 0 : index
    %c0_0 = arith.constant 0 : index
    %0 = vector.load %arg1[%c0, %c0_0] : memref<8x128xf32, #tpu.memory_space<vmem>>, vector<8x128xf32>
    %c0_1 = arith.constant 0 : index
    %c0_2 = arith.constant 0 : index
    %c0_3 = arith.constant 0 : index
    %1 = vector.load %arg0[%c0_1, %c0_2, %c0_3] : memref<1x8x1xf32, #tpu.memory_space<vmem>>, vector<1x8x1xf32>
    %2 = vector.shape_cast %1 : vector<1x8x1xf32> to vector<8x1xf32>
    %3 = vector.extract_strided_slice %0 {offsets = [0, 0], sizes = [8, 32], strides = [1, 1]} : vector<8x128xf32> to vector<8x32xf32>
    %4 = vector.extract_strided_slice %0 {offsets = [0, 64], sizes = [8, 32], strides = [1, 1]} : vector<8x128xf32> to vector<8x32xf32>
    %c0_4 = arith.constant 0 : index
    %c0_5 = arith.constant 0 : index
    %5 = vector.load %arg2[%c0_4, %c0_5] : memref<136x128xf32, #tpu.memory_space<vmem>>, vector<1x128xf32>
    %6 = vector.broadcast %2 : vector<8x1xf32> to vector<8x128xf32>
    %7 = vector.broadcast %5 : vector<1x128xf32> to vector<8x128xf32>
    %8 = arith.mulf %6, %7 : vector<8x128xf32>
    %c8 = arith.constant 8 : index
    %c0_6 = arith.constant 0 : index
    %9 = vector.load %arg2[%c8, %c0_6] : memref<136x128xf32, #tpu.memory_space<vmem>>, vector<32x128xf32>
    %cst = arith.constant dense<0.000000e+00> : vector<8x128xf32>
    %10 = tpu.matmul %3, %9, %cst {dimension_numbers = #tpu.dot_dimension_numbers<[1], [0], [0], [1], [0, 0, 1, 1], [], []>} : vector<8x32xf32>, vector<32x128xf32>, vector<8x128xf32> -> vector<8x128xf32>
    %11 = arith.addf %8, %10 : vector<8x128xf32>
    %c1 = arith.constant 1 : index
    %c0_7 = arith.constant 0 : index
    %12 = vector.load %arg2[%c1, %c0_7] : memref<136x128xf32, #tpu.memory_space<vmem>>, vector<1x128xf32>
    %13 = vector.broadcast %12 : vector<1x128xf32> to vector<8x128xf32>
    %14 = arith.addf %11, %13 : vector<8x128xf32>
    %15 = vector.extract_strided_slice %14 {offsets = [0, 0], sizes = [8, 32], strides = [1, 1]} : vector<8x128xf32> to vector<8x32xf32>
    %16 = arith.negf %15 : vector<8x32xf32>
    %17 = math.exp %16 : vector<8x32xf32>
    %cst_8 = arith.constant 1.000000e+00 : f32
    %18 = vector.broadcast %cst_8 : f32 to vector<8x32xf32>
    %19 = arith.addf %18, %17 : vector<8x32xf32>
    %20 = arith.divf %18, %19 : vector<8x32xf32>
    %21 = vector.extract_strided_slice %14 {offsets = [0, 32], sizes = [8, 32], strides = [1, 1]} : vector<8x128xf32> to vector<8x32xf32>
    %22 = arith.negf %21 : vector<8x32xf32>
    %23 = math.exp %22 : vector<8x32xf32>
    %cst_9 = arith.constant 1.000000e+00 : f32
    %24 = vector.broadcast %cst_9 : f32 to vector<8x32xf32>
    %25 = arith.addf %24, %23 : vector<8x32xf32>
    %26 = arith.divf %24, %25 : vector<8x32xf32>
    %27 = vector.extract_strided_slice %14 {offsets = [0, 64], sizes = [8, 32], strides = [1, 1]} : vector<8x128xf32> to vector<8x32xf32>
    %28 = math.tanh %27 : vector<8x32xf32>
    %29 = vector.extract_strided_slice %14 {offsets = [0, 96], sizes = [8, 32], strides = [1, 1]} : vector<8x128xf32> to vector<8x32xf32>
    %30 = arith.negf %29 : vector<8x32xf32>
    %31 = math.exp %30 : vector<8x32xf32>
    %cst_10 = arith.constant 1.000000e+00 : f32
    %32 = vector.broadcast %cst_10 : f32 to vector<8x32xf32>
    %33 = arith.addf %32, %31 : vector<8x32xf32>
    %34 = arith.divf %32, %33 : vector<8x32xf32>
    %35 = arith.mulf %26, %4 : vector<8x32xf32>
    %36 = arith.mulf %20, %28 : vector<8x32xf32>
    %37 = arith.addf %35, %36 : vector<8x32xf32>
    %38 = math.tanh %37 : vector<8x32xf32>
    %39 = arith.mulf %34, %38 : vector<8x32xf32>
    %40 = vector.extract_strided_slice %0 {offsets = [0, 32], sizes = [8, 32], strides = [1, 1]} : vector<8x128xf32> to vector<8x32xf32>
    %41 = vector.extract_strided_slice %0 {offsets = [0, 96], sizes = [8, 32], strides = [1, 1]} : vector<8x128xf32> to vector<8x32xf32>
    %42 = tpu.concatenate %39, %40 in 1 : vector<8x32xf32>, vector<8x32xf32> -> vector<8x64xf32>
    %c40 = arith.constant 40 : index
    %c0_11 = arith.constant 0 : index
    %43 = vector.load %arg2[%c40, %c0_11] : memref<136x128xf32, #tpu.memory_space<vmem>>, vector<64x128xf32>
    %cst_12 = arith.constant dense<0.000000e+00> : vector<8x128xf32>
    %44 = tpu.matmul %42, %43, %cst_12 {dimension_numbers = #tpu.dot_dimension_numbers<[1], [0], [0], [1], [0, 0, 1, 1], [], []>} : vector<8x64xf32>, vector<64x128xf32>, vector<8x128xf32> -> vector<8x128xf32>
    %c2 = arith.constant 2 : index
    %c0_13 = arith.constant 0 : index
    %45 = vector.load %arg2[%c2, %c0_13] : memref<136x128xf32, #tpu.memory_space<vmem>>, vector<1x128xf32>
    %46 = vector.broadcast %45 : vector<1x128xf32> to vector<8x128xf32>
    %47 = arith.addf %44, %46 : vector<8x128xf32>
    %48 = vector.extract_strided_slice %47 {offsets = [0, 0], sizes = [8, 32], strides = [1, 1]} : vector<8x128xf32> to vector<8x32xf32>
    %49 = arith.negf %48 : vector<8x32xf32>
    %50 = math.exp %49 : vector<8x32xf32>
    %cst_14 = arith.constant 1.000000e+00 : f32
    %51 = vector.broadcast %cst_14 : f32 to vector<8x32xf32>
    %52 = arith.addf %51, %50 : vector<8x32xf32>
    %53 = arith.divf %51, %52 : vector<8x32xf32>
    %54 = vector.extract_strided_slice %47 {offsets = [0, 32], sizes = [8, 32], strides = [1, 1]} : vector<8x128xf32> to vector<8x32xf32>
    %55 = arith.negf %54 : vector<8x32xf32>
    %56 = math.exp %55 : vector<8x32xf32>
    %cst_15 = arith.constant 1.000000e+00 : f32
    %57 = vector.broadcast %cst_15 : f32 to vector<8x32xf32>
    %58 = arith.addf %57, %56 : vector<8x32xf32>
    %59 = arith.divf %57, %58 : vector<8x32xf32>
    %60 = vector.extract_strided_slice %47 {offsets = [0, 64], sizes = [8, 32], strides = [1, 1]} : vector<8x128xf32> to vector<8x32xf32>
    %61 = math.tanh %60 : vector<8x32xf32>
    %62 = vector.extract_strided_slice %47 {offsets = [0, 96], sizes = [8, 32], strides = [1, 1]} : vector<8x128xf32> to vector<8x32xf32>
    %63 = arith.negf %62 : vector<8x32xf32>
    %64 = math.exp %63 : vector<8x32xf32>
    %cst_16 = arith.constant 1.000000e+00 : f32
    %65 = vector.broadcast %cst_16 : f32 to vector<8x32xf32>
    %66 = arith.addf %65, %64 : vector<8x32xf32>
    %67 = arith.divf %65, %66 : vector<8x32xf32>
    %68 = arith.mulf %59, %41 : vector<8x32xf32>
    %69 = arith.mulf %53, %61 : vector<8x32xf32>
    %70 = arith.addf %68, %69 : vector<8x32xf32>
    %71 = math.tanh %70 : vector<8x32xf32>
    %72 = arith.mulf %67, %71 : vector<8x32xf32>
    %c104 = arith.constant 104 : index
    %c0_17 = arith.constant 0 : index
    %73 = vector.load %arg2[%c104, %c0_17] : memref<136x128xf32, #tpu.memory_space<vmem>>, vector<32x128xf32>
    %cst_18 = arith.constant dense<0.000000e+00> : vector<8x128xf32>
    %74 = tpu.matmul %72, %73, %cst_18 {dimension_numbers = #tpu.dot_dimension_numbers<[1], [0], [0], [1], [0, 0, 1, 1], [], []>} : vector<8x32xf32>, vector<32x128xf32>, vector<8x128xf32> -> vector<8x128xf32>
    %c3 = arith.constant 3 : index
    %c0_19 = arith.constant 0 : index
    %75 = vector.load %arg2[%c3, %c0_19] : memref<136x128xf32, #tpu.memory_space<vmem>>, vector<1x128xf32>
    %76 = vector.broadcast %75 : vector<1x128xf32> to vector<8x128xf32>
    %77 = arith.addf %74, %76 : vector<8x128xf32>
    %78 = tpu.concatenate %39, %72, %37, %70 in 1 : vector<8x32xf32>, vector<8x32xf32>, vector<8x32xf32>, vector<8x32xf32> -> vector<8x128xf32>
    %c0_20 = arith.constant 0 : index
    %c0_21 = arith.constant 0 : index
    %c0_22 = arith.constant 0 : index
    %79 = vector.load %arg3[%c0_20, %c0_21, %c0_22] : memref<1x8x128xf32, #tpu.memory_space<vmem>>, vector<1x8x128xf32>
    %80 = vector.shape_cast %79 : vector<1x8x128xf32> to vector<8x128xf32>
    %81 = vector.shape_cast %77 : vector<8x128xf32> to vector<1x8x128xf32>
    tpu.vector_store %arg3[%c0_20, %c0_21, %c0_22], %81 {strides = array<i32>} : memref<1x8x128xf32, #tpu.memory_space<vmem>>, vector<1x8x128xf32>,
    %c0_23 = arith.constant 0 : index
    %c0_24 = arith.constant 0 : index
    %82 = vector.load %arg4[%c0_23, %c0_24] : memref<8x128xf32, #tpu.memory_space<vmem>>, vector<8x128xf32>
    tpu.vector_store %arg4[%c0_23, %c0_24], %78 {strides = array<i32>} : memref<8x128xf32, #tpu.memory_space<vmem>>, vector<8x128xf32>,
    return
  }
}

</mosaic_0001>

<bundles_post_ra>
// kernel: tpu_custom_call.1
= control target key start
LH: loop header
LB: loop body
LE: loop exit
PB: predicated region body
PF: predicated region fallthrough
CT: control target
= control target key end

     0   :  { %10 = vsyncpa [#allocation3], 0  ;;  %s718_s0 = inlined_call_operand.vmem [shape: f32[1,8,1], index: 0, kind: input, shape index: {}]   ;;  %s719_s1 = inlined_call_operand.vmem [shape: f32[8,128], index: 1, kind: input, shape index: {}]   ;;  %s720_s2 = inlined_call_operand.hbm [shape: f32[136,128], index: 2, kind: input, shape index: {}]   ;;  %s721_s3 = inlined_call_operand.hbm [shape: f32[1,8,128], index: 3, kind: output, shape index: {0}]   ;;  %s722_s4 = inlined_call_operand.hbm [shape: f32[8,128], index: 4, kind: output, shape index: {1}]  }
   0x1   :  { %11 = vsyncpa [#allocation4], 0 }
   0x2   :  { %12 = vsyncpa [#allocation7], 0  ;;  %s600_s15 = smov [#allocation2]   ;;  %s528_s19 = scalar_lea.hbm %s720_s2, 2176 }
   0x3   :  { %s22_s16 = sshll.u32 %s600_s15, 4  ;;  %p529_p0 = scmp.ne.s32.totalorder %s720_s2, %s528_s19  ;;  %s23_s16 = int_to_ptr.vmem [resolvable:$true] %s22_s16 }
   0x4   :  { %p532_p1 = scmp.lt.u32.totalorder %s528_s19, %s720_s2 }
   0x6   :  { %p534_p2 = pnand %p532_p1, %p529_p0 }
   0x8   :  { %537 = shalt.err (!%p534_p2)
}
   0x9   :  { %s538_s24 = scalar_lea.vmem %s23_s16, 2176  ;;  %p543_p4 = scmp.lt.s32.totalorder %s23_s16, %s23_s16 }
   0xa   :  { %p539_p3 = scmp.ne.s32.totalorder %s23_s16, %s538_s24  ;;  %p544_p5 = scmp.lt.s32.totalorder %s538_s24, %s538_s24 }
   0xc   :  { %p545_p6 = por %p544_p5, %p543_p4 }
   0xe   :  { %p546_p7 = pnand %p545_p6, %p539_p3 }
  0x10   :  { %549 = shalt.err (!%p546_p7)
}
  0x11   :  { %s601_s25 = smov 128   ;;  %s602_s26 = smov 8  }
  0x12   :  { %28 = dma.hbm_to_vmem [thread:$0]  %s720_s2, 2176, %s23_s16, [#allocation3], %s601_s25, %s601_s25, %s602_s26  }
  0x13   :  { %594 = dma.done.wait [#allocation3], 2176  }
  0x14   :  { %595 = vsyncadd [#allocation3], 4294965120  ;;  %v603_v0 = vmov 0.0|0.0   ;;  %vm604_vm0 = vmmov 0   ;;  %v605_v1 = vmov 0.0   ;;  %v606_v2 = vmov 0  }
  0x15   :  { %475 = vmatprep.subr.bf16.mxu0 %v603_v0  ;;  %442 = vmatprep.mubr.msk.f32.mxu0 %vm604_vm0, %v605_v1  ;;  %v45_v3 = vld [vmem:[#allocation2 + $0x8] sm:$0xff]  ;;  %v46_v4 = vld [vmem:[#allocation2 + $0x10] sm:$0xff]  ;;  %v47_v5 = vld [vmem:[#allocation2 + $0x18] sm:$0xff]  ;;  %s607_s6 = smov 96   ;;  %vm49_vm1 = vcmask 261120   ;;  %vm175_vm2 = vcmask 523264  }
  0x16   :  { %511 = vset.pattern.permute.xlu0 %v606_v2  ;;  %481 = vmatprep.subr.bf16.mxu1 %v603_v0  ;;  %v476_v6 = vpack.c.bf16 %v46_v4, %v45_v3  ;;  %v48_v7 = vld [vmem:[#allocation2 + $0x20] sm:$0xff]  ;;  %v656_v8 = vld [vmem:[%s719_s1] sm:$0xff]  ;;  %s609_s1 = smov 32   ;;  %v162_v30 = vld [vmem:[#allocation2 + $0x28] sm:$0xff]  ;;  %vm373_vm3 = vcmask 785408   ;;  %s610_s7 = smov [#allocation6]  }
  0x17   :  { %461 = vmatprep.mubr.msk.f32.mxu1 %vm604_vm0, %v605_v1  ;;  %v33_v9 = vld [vmem:[%s718_s0] sm:$0xff]  ;;  %137 = vrot.lane.b32.xlu1 %v656_v8, %s607_s6  ;;  %v479_v10 = vpack.c.bf16 %v48_v7, %v47_v5  ;;  %v406_v11 = vld [vmem:[#allocation2] ss:$0 sm:$0xff]  ;;  %v408_v15 = vld [vmem:[#allocation2 + $0x1] ss:$0 sm:$0xff]  ;;  %s608_s0 = smov 64  }
  0x18   :  { %37 = vperm.xlu0 %511, %v33_v9   ;;  %477 = vmatpush3.bf16.msra.mxu0 %v476_v6  ;;  %v163_v31 = vld [vmem:[#allocation2 + $0x30] sm:$0xff]  ;;  %v164_v32 = vld [vmem:[#allocation2 + $0x38] sm:$0xff]  ;;  %v165_v34 = vld [vmem:[#allocation2 + $0x40] sm:$0xff]  ;;  %s393_s8 = sshll.u32 %s610_s7, 4  ;;  %s394_s8 = int_to_ptr.vmem [resolvable:$true] %s393_s8 }
  0x19   :  { %478 = vmatprep.subr.bf16.mxu0 %v603_v0  ;;  %v482_v33 = vpack.c.bf16 %v163_v31, %v162_v30  ;;  %v485_v35 = vpack.c.bf16 %v165_v34, %v164_v32  ;;  %v166_v36 = vld [vmem:[#allocation2 + $0x48] sm:$0xff]  ;;  %v167_v37 = vld [vmem:[#allocation2 + $0x50] sm:$0xff]  ;;  %v168_v39 = vld [vmem:[#allocation2 + $0x58] sm:$0xff]  ;;  %s550_s9 = scalar_lea.vmem %s394_s8, 128  ;;  %p555_p9 = scmp.lt.s32.totalorder %s394_s8, %s394_s8 }
  0x1a   :  { %v488_v38 = vpack.c.bf16 %v167_v37, %v166_v36  ;;  %v169_v40 = vld [vmem:[#allocation2 + $0x60] sm:$0xff]  ;;  %v276_v62 = vld [vmem:[#allocation2 + $0x68] sm:$0xff]  ;;  %v277_v63 = vld [vmem:[#allocation2 + $0x70] sm:$0xff]  ;;  %p551_p8 = scmp.ne.s32.totalorder %s394_s8, %s550_s9  ;;  %p556_p10 = scmp.lt.s32.totalorder %s550_s9, %s550_s9 }
  0x1b   :  { %483 = vmatpush3.bf16.msra.mxu1 %v482_v33  ;;  %v491_v42 = vpack.c.bf16 %v169_v40, %v168_v39  ;;  %v410_v47 = vld [vmem:[#allocation2 + $0x2] ss:$0 sm:$0xff]  ;;  %v494_v2 = vpack.c.bf16 %v277_v63, %v276_v62 }
  0x1c   :  { %480 = vmatpush3.bf16.msra.mxu0 %v479_v10  ;;  %484 = vmatprep.subr.bf16.mxu1 %v603_v0  ;;  %v279_v3 = vld [vmem:[#allocation2 + $0x80] sm:$0xff]  ;;  %p557_p11 = por %p556_p10, %p555_p9 }
  0x1d   :  { %493 = vmatprep.subr.bf16.mxu0 %v603_v0 }
  0x1e   :  { %p558_p12 = pnand %p557_p11, %p551_p8 }
  0x1f   :  { %443 = vmatmul.mubr.msk.f32.vlgmr.msra.gmra.mrb[0].mxu0 %vm49_vm1, %v656_v8  ;;  %486 = vmatpush3.bf16.msra.mxu1 %v485_v35 }
  0x20   :  { %472 = vmatprep.mubr.msk.f32.mxu0 %vm604_vm0, %v605_v1  ;;  %487 = vmatprep.subr.bf16.mxu1 %v603_v0  ;;  %v278_v1 = vld [vmem:[#allocation2 + $0x78] sm:$0xff] }
  0x21   :  { %495 = vmatpush3.bf16.msra.mxu0 %v494_v2  ;;  %v497_v4 = vpack.c.bf16 %v279_v3, %v278_v1 }
  0x22   :  { %496 = vmatprep.subr.bf16.mxu0 %v603_v0 }
  0x23   :  { %489 = vmatpush3.bf16.msra.mxu1 %v488_v38 }
  0x24   :  { %490 = vmatprep.subr.bf16.mxu1 %v603_v0 }
  0x25   :  { %498 = vmatpush3.bf16.msra.mxu0 %v497_v4 }
  0x27   :  { %492 = vmatpush3.bf16.msra.mxu1 %v491_v42 }
  0x89   :  { %v138_v26 = vpop.permute.xlu1 %137 }
  0x97   :  { %v38_v12 = vpop.permute.xlu0 %37 }
  0x98   :  { %v44_v13 = vmul.f32 %v406_v11, %v38_v12 }
  0xf2   :  { %v119_v14 = vpop.f32.mrb[0].mxu0 }
  0xf3   :  { %v123_v16 = vadd.f32 %v119_v14, %v44_v13  ;;  %v444_v17 = vpop.f32.mrb[1].mxu0 }
  0xf5   :  { %v129_v18 = vadd.f32 %v408_v15, %v123_v16 }
  0xf7   :  { %512 = vtanh.f32 %v129_v18  ;;  %v409_v20 = vmul.f32 -1.442695, %v129_v18 }
  0xf9   :  { %514 = vpow2.f32 %v409_v20 }
 0x101   :  { %v513_v19 = vpop.eup %512 }
 0x102   :  { %142 = vrot.lane.b32.xlu0 %v513_v19, %s608_s0 }
 0x103   :  { %v515_v21 = vpop.eup %514 }
 0x104   :  { %v133_v22 = vadd.f32 1.0, %v515_v21 }
 0x106   :  { %516 = vrcp.f32 %v133_v22 }
 0x110   :  { %v517_v23 = vpop.eup %516 }
 0x111   :  { %v140_v27 = vmul.f32 %v517_v23, %v138_v26 }
 0x174   :  { %v143_v24 = vpop.permute.xlu0 %142 }
 0x175   :  { %v145_v25 = vmul.f32 %v517_v23, %v143_v24 }
 0x177   :  { %147 = vrot.lane.b32.xlu1 %v145_v25, %s609_s1 }
 0x1e9   :  { %v148_v28 = vpop.permute.xlu1 %147 }
 0x1ea   :  { %v669_v29 = vadd.f32 %v148_v28, %v140_v27 }
 0x1ec   :  { %518 = vtanh.f32 %v669_v29 }
 0x1f6   :  { %v519_v41 = vpop.eup %518 }
 0x1f7   :  { %153 = vrot.lane.b32.xlu0 %v519_v41, %s608_s0 }
 0x269   :  { %v154_v43 = vpop.permute.xlu0 %153 }
 0x26a   :  { %v156_v44 = vmul.f32 %v517_v23, %v154_v43 }
 0x26c   :  { %158 = vrot.lane.b32.xlu1 %v156_v44, %s609_s1 }
 0x270   :  { %256 = vrot.lane.b32.xlu1 %v656_v8, %s608_s0 }
 0x2de   :  { %v159_v45 = vpop.permute.xlu1 %158 }
 0x2df   :  { %v161_v46 = vsel %vm49_vm1, %v159_v45, %v656_v8 }
 0x2e0   :  { %462 = vmatmul.mubr.msk.f32.vlgmr.msra.gmra.mrb[0].mxu1 %vm175_vm2, %v161_v46 }
 0x2e2   :  { %v257_v58 = vpop.permute.xlu1 %256 }
 0x3b3   :  { %v245_v48 = vpop.f32.mrb[0].mxu1 }
 0x3b4   :  { %v246_v49 = vadd.f32 %v410_v47, %v245_v48  ;;  %v463_v50 = vpop.f32.mrb[1].mxu1 }
 0x3b6   :  { %520 = vtanh.f32 %v246_v49  ;;  %v412_v52 = vmul.f32 -1.442695, %v246_v49 }
 0x3b8   :  { %522 = vpow2.f32 %v412_v52 }
 0x3c0   :  { %v521_v51 = vpop.eup %520 }
 0x3c1   :  { %261 = vrot.lane.b32.xlu0 %v521_v51, %s608_s0 }
 0x3c2   :  { %v523_v53 = vpop.eup %522 }
 0x3c3   :  { %v252_v54 = vadd.f32 1.0, %v523_v53 }
 0x3c5   :  { %524 = vrcp.f32 %v252_v54 }
 0x3cf   :  { %v525_v55 = vpop.eup %524 }
 0x3d0   :  { %v259_v59 = vmul.f32 %v525_v55, %v257_v58 }
 0x433   :  { %v262_v56 = vpop.permute.xlu0 %261 }
 0x434   :  { %v264_v57 = vmul.f32 %v525_v55, %v262_v56 }
 0x436   :  { %266 = vrot.lane.b32.xlu0 %v264_v57, %s609_s1 }
 0x4a8   :  { %v267_v60 = vpop.permute.xlu0 %266 }
 0x4a9   :  { %v269_v61 = vadd.f32 %v267_v60, %v259_v59 }
 0x4ab   :  { %526 = vtanh.f32 %v269_v61 }
 0x4b5   :  { %v527_v5 = vpop.eup %526 }
 0x4b6   :  { %272 = vrot.lane.b32.xlu1 %v527_v5, %s608_s0 }
 0x528   :  { %v273_v6 = vpop.permute.xlu1 %272 }
 0x529   :  { %v275_v7 = vmul.f32 %v525_v55, %v273_v6 }
 0x52b   :  { %360 = vrot.lane.b32.xlu1 %v275_v7, %s608_s0  ;;  %286 = vrot.lane.b32.xlu0 %v275_v7, %s609_s1 }
 0x52f   :  { %368 = vrot.lane.b32.xlu1 %v269_v61, %s608_s0  ;;  %364 = vrot.lane.b32.xlu0 %v669_v29, %s609_s1 }
 0x59d   :  { %v361_v8 = vpop.permute.xlu1 %360  ;;  %v287_v9 = vpop.permute.xlu0 %286 }
 0x59e   :  { %473 = vmatmul.mubr.msk.f32.vlgmr.msra.gmra.mrb[2].mxu0 %vm49_vm1, %v287_v9  ;;  %v371_v0 = vsel %vm49_vm1, %v159_v45, %v361_v8 }
 0x5a1   :  { %v369_v10 = vpop.permute.xlu1 %368  ;;  %v365_v11 = vpop.permute.xlu0 %364 }
 0x5a2   :  { %v372_v12 = vsel %vm175_vm2, %v371_v0, %v365_v11 }
 0x5a3   :  { %v374_v13 = vsel %vm373_vm3, %v372_v12, %v369_v10 }
 0x5a4   :  { %376 = vst [vmem:[#allocation6] sm:$0xff] %v374_v13 }
 0x5a5   :  { %561 = shalt.err (!%p558_p12)
}
 0x5a6   :  { %s562_s12 = scalar_lea.hbm %s722_s4, 128 }
 0x5a7   :  { %p563_p13 = scmp.ne.s32.totalorder %s722_s4, %s562_s12  ;;  %p566_p0 = scmp.lt.u32.totalorder %s562_s12, %s722_s4 }
 0x5a9   :  { %p568_p1 = pnand %p566_p0, %p563_p13 }
 0x5ab   :  { %571 = shalt.err (!%p568_p1)
}
 0x5ac   :  { %396 = dma.vmem_to_hbm [thread:$0]  %s394_s8, 128, %s722_s4, [#allocation7]   ;;  %v413_v14 = vld [vmem:[#allocation2 + $0x3] ss:$0 sm:$0xff] }
 0x5ad   :  { %s611_s19 = smov [#allocation5]  }
 0x5ae   :  { %s383_s20 = sshll.u32 %s611_s19, 4  ;;  %s384_s20 = int_to_ptr.vmem [resolvable:$true] %s383_s20 }
 0x5af   :  { %s572_s21 = scalar_lea.vmem %s384_s20, 128  ;;  %p577_p3 = scmp.lt.s32.totalorder %s384_s20, %s384_s20 }
 0x5b0   :  { %p573_p2 = scmp.ne.s32.totalorder %s384_s20, %s572_s21  ;;  %p578_p4 = scmp.lt.s32.totalorder %s572_s21, %s572_s21 }
 0x5b2   :  { %p579_p5 = por %p578_p4, %p577_p3 }
 0x5b4   :  { %p580_p6 = pnand %p579_p5, %p573_p2 }
 0x671   :  { %v356_v15 = vpop.f32.mrb[2].mxu0 }
 0x672   :  { %v357_v16 = vadd.f32 %v413_v14, %v356_v15  ;;  %v474_v17 = vpop.f32.mrb[3].mxu0 }
 0x674   :  { %375 = vst [vmem:[#allocation5] sm:$0xff] %v357_v16 }
 0x675   :  { %583 = shalt.err (!%p580_p6)
}
 0x676   :  { %s584_s24 = scalar_lea.hbm %s721_s3, 128 }
 0x677   :  { %p585_p7 = scmp.ne.s32.totalorder %s721_s3, %s584_s24  ;;  %p588_p8 = scmp.lt.u32.totalorder %s584_s24, %s721_s3 }
 0x679   :  { %p590_p9 = pnand %p588_p8, %p585_p7 }
 0x67b   :  { %593 = shalt.err (!%p590_p9)
}
 0x67c   :  { %386 = dma.vmem_to_hbm [thread:$0]  %s384_s20, 128, %s721_s3, [#allocation4]  }
 0x67d   :  { %596 = dma.done.wait [#allocation4], 128  }
 0x67e   :  { %597 = vsyncadd [#allocation4], 4294967168 }
 0x67f   :  { %598 = dma.done.wait [#allocation7], 128  }
 0x680   :  { %599 = vsyncadd [#allocation7], 4294967168 }
 0x681   :  { %403 = vsyncpa [#allocation3], 1 }
 0x682   :  { %404 = vsyncpa [#allocation4], 1 }
 0x683   :  { %405 = vsyncpa [#allocation7], 1 }

</bundles_post_ra>
